<compile_context>
chip_gen: v6e
topology: v6e:2x2x1
jax: 0.10.0
libtpu: 0.0.40
codegen_flags: <defaults>
</compile_context>

<pallas_src>
import jax
import jax.numpy as jnp
from jax.experimental import pallas as pl
from jax.experimental.pallas import tpu as pltpu

HIDDEN = 256
_MIB = 1024 * 1024


def _cdiv(a, b):
    return (a + b - 1) // b


def _round_up(n, m):
    return _cdiv(n, m) * m


def _pad_to(a, shape):
    return jnp.pad(a, [(0, s - d) for d, s in zip(a.shape, shape)])


def _make_kernel(num_chunks, tile_b):
    chunk = tile_b // num_chunks

    def kernel(x_ref, w1_ref, b1_ref, w23_ref, b23_ref, w4_ref, b4_ref, o_ref):
        # Hoisted once per grid step: JAX does not CSE broadcast_in_dim, so
        # loading / broadcasting the biases inside the chunk loop would pay
        # the cost `num_chunks` times.
        w1, w23, w4 = w1_ref[...], w23_ref[...], w4_ref[...]
        b1, b23, b4 = b1_ref[...], b23_ref[...], b4_ref[...]

        # Static loop over independent batch sub-chunks: the chains are
        # independent, so the scheduler can interleave MXU pushes of chunk
        # c+1 with the VPU epilogue (bias + ReLU + cast) of chunk c, while
        # keeping live f32 intermediates small (fewer vreg spills).
        for c in range(num_chunks):
            r0 = c * chunk
            x = x_ref[pl.ds(r0, chunk), :]                                  # bf16

            h1 = jnp.dot(x, w1, preferred_element_type=jnp.float32) + b1    # f32
            h1 = jnp.maximum(h1, 0.0).astype(jnp.bfloat16)

            # Fused encoder-Linear2 + decoder-Linear1 (W23 = W2 @ W3).
            h2 = jnp.dot(h1, w23, preferred_element_type=jnp.float32) + b23
            h2 = jnp.maximum(h2, 0.0).astype(jnp.bfloat16)

            y = jnp.dot(h2, w4, preferred_element_type=jnp.float32) + b4    # f32

            o_ref[pl.ds(r0, chunk), :] = y.astype(o_ref.dtype)

    return kernel


def _choose_tile_b(B, tile_b_max):
    """Balanced batch tiles (minimize last-tile padding), multiple of 16 for
    bf16 sublane packing, and >=2 grid steps when the batch allows it (lets
    dimension_semantics=("parallel",) shard across v7x's 2 TensorCores)."""
    if B <= 16:
        return 16
    n_tiles = max(_cdiv(B, tile_b_max), 2)
    return max(16, _round_up(_cdiv(B, n_tiles), 16))


def _choose_num_chunks(tile_b):
    """Prefer ~64-row sub-chunks (multiple of 16) inside a grid step."""
    if tile_b >= 128 and tile_b % 64 == 0:
        return tile_b // 64
    if tile_b >= 64 and (tile_b // 2) % 16 == 0:
        return 2
    return 1


def _vmem_need_bytes(tile_b, Dp, out_bytes):
    x_stream = 2 * tile_b * Dp * 2               # double-buffered bf16 input
    o_stream = 2 * tile_b * Dp * out_bytes       # double-buffered output
    weights = (2 * Dp * HIDDEN + HIDDEN * HIDDEN) * 2   # single-buffered bf16
    biases = (2 * HIDDEN + Dp) * 4
    return x_stream + o_stream + weights + biases


def diffusion_embedding_forward(x, params, *, tile_b=512, out_dtype=jnp.float32):
    """x: (B, D) float32. params: weights in (in, out) layout, biases (1, out)."""
    B, D = x.shape
    out_bytes = jnp.dtype(out_dtype).itemsize

    # --- Generation-aware VMEM budget (v7x: 64 MiB physical per TC,
    #     v5e/v6e: 128 MiB).  Fallback is conservative and valid everywhere.
    try:
        phys_vmem = int(getattr(pltpu.get_tpu_info(), "vmem_capacity_bytes",
                                64 * _MIB))
    except Exception:
        phys_vmem = 64 * _MIB
    vmem_limit = min(phys_vmem * 3 // 4, 96 * _MIB)
    budget = int(vmem_limit * 0.9)

    # --- Lane-dense feature padding + balanced, VMEM-budget-gated batch tile.
    Dp = _round_up(max(D, 1), 128)
    TILE_B = _choose_tile_b(B, tile_b)
    while TILE_B > 16 and _vmem_need_bytes(TILE_B, Dp, out_bytes) > budget:
        TILE_B = max(16, _round_up(TILE_B // 2, 16))
    Bp = _round_up(B, TILE_B)
    grid = (Bp // TILE_B,)
    num_chunks = _choose_num_chunks(TILE_B)

    # --- Weight prep.  Fuse the two middle Linears (no nonlinearity between
    #     them) in f32, then cast once to bf16:
    #       W23 = W2 @ W3   (256, 256)
    #       b23 = b2 @ W3 + b3
    w23_f32 = params["w2"] @ params["w3"]
    b23_f32 = params["b2"] @ params["w3"] + params["b3"]

    xp = _pad_to(x, (Bp, Dp)).astype(jnp.bfloat16)
    w1 = _pad_to(params["w1"], (Dp, HIDDEN)).astype(jnp.bfloat16)
    b1 = params["b1"].astype(jnp.float32)
    w23 = w23_f32.astype(jnp.bfloat16)
    b23 = b23_f32.astype(jnp.float32)
    w4 = _pad_to(params["w4"], (HIDDEN, Dp)).astype(jnp.bfloat16)
    b4 = _pad_to(params["b4"], (1, Dp)).astype(jnp.float32)

    kernel = _make_kernel(num_chunks, TILE_B)

    flops = 2 * Bp * (2 * Dp * HIDDEN + HIDDEN * HIDDEN)
    bytes_accessed = (Bp * Dp * 2 + Bp * Dp * out_bytes
                      + (2 * Dp * HIDDEN + HIDDEN * HIDDEN) * 2
                      + (2 * HIDDEN + Dp) * 4)

    stream = pl.BlockSpec((TILE_B, Dp), lambda i: (i, 0))

    def run(single_buffer_weights):
        # Weights/biases have constant index_maps (VMEM-resident across all
        # grid steps); single-buffering halves their VMEM footprint (matters
        # most on v7x's 64 MiB VMEM).  x / out stay default double-buffered.
        kw = {"pipeline_mode": pl.Buffered(1)} if single_buffer_weights else {}
        resident = lambda shape: pl.BlockSpec(shape, lambda i: (0, 0), **kw)
        return pl.pallas_call(
            kernel,
            out_shape=jax.ShapeDtypeStruct((Bp, Dp), out_dtype),
            grid=grid,
            in_specs=[
                stream,                        # x
                resident((Dp, HIDDEN)),        # W1
                resident((1, HIDDEN)),         # b1
                resident((HIDDEN, HIDDEN)),    # W23 (fused W2 @ W3)
                resident((1, HIDDEN)),         # b23 (fused b2 @ W3 + b3)
                resident((HIDDEN, Dp)),        # W4
                resident((1, Dp)),             # b4
            ],
            out_specs=stream,
            compiler_params=pltpu.CompilerParams(
                dimension_semantics=("parallel",),   # megacore batch sharding
                vmem_limit_bytes=int(vmem_limit),
            ),
            cost_estimate=pl.CostEstimate(
                flops=flops, transcendentals=0, bytes_accessed=bytes_accessed),
        )(xp, w1, b1, w23, b23, w4, b4)

    try:
        out = run(single_buffer_weights=True)
    except Exception:
        # Fallback for jax versions without BlockSpec(pipeline_mode=...).
        out = run(single_buffer_weights=False)

    return out[:B, :D]


def init_params(key, embedding_dim, hidden=HIDDEN):
    """Deterministic synthetic init (uniform, roughly like torch's default)."""
    ks = jax.random.split(key, 8)

    def lin(kw, kb, fan_in, fan_out):
        bound = 1.0 / jnp.sqrt(fan_in)
        w = jax.random.uniform(kw, (fan_in, fan_out), jnp.float32, -bound, bound)
        b = jax.random.uniform(kb, (1, fan_out), jnp.float32, -bound, bound)
        return w, b

    w1, b1 = lin(ks[0], ks[1], embedding_dim, hidden)   # encoder Linear(D, 256)
    w2, b2 = lin(ks[2], ks[3], hidden, embedding_dim)   # encoder Linear(256, D)
    w3, b3 = lin(ks[4], ks[5], embedding_dim, hidden)   # decoder Linear(D, 256)
    w4, b4 = lin(ks[6], ks[7], hidden, embedding_dim)   # decoder Linear(256, D)
    return dict(w1=w1, b1=b1, w2=w2, b2=b2, w3=w3, b3=b3, w4=w4, b4=b4)


def reference_forward(x, p):
    """Pure-JAX f32 reference of the PyTorch module (encode -> decode)."""
    h1 = jnp.maximum(x @ p["w1"] + p["b1"], 0.0)
    enc = h1 @ p["w2"] + p["b2"]
    h2 = jnp.maximum(enc @ p["w3"] + p["b3"], 0.0)
    return h2 @ p["w4"] + p["b4"]


if __name__ == "__main__":
    key = jax.random.PRNGKey(0)
    k_x, k_p = jax.random.split(key)

    batch, embedding_dim = 8, 32
    x = jax.random.normal(k_x, (batch, embedding_dim), jnp.float32)
    params = init_params(k_p, embedding_dim)

    out = diffusion_embedding_forward(x, params)
    out = jax.block_until_ready(out)

    ref = reference_forward(x, params)
    assert out.shape == (batch, embedding_dim)
    assert bool(jnp.all(jnp.isfinite(out))), "non-finite output"
    # bf16 MXU operands (f32 accumulation) vs. a pure-f32 reference: allow
    # bf16-level deviation.
    assert jnp.allclose(out, ref, atol=3e-2, rtol=3e-2), "mismatch vs reference"

    print("KERNEL_OK")
</pallas_src>

<mosaic_0001>
module attributes {stable_mosaic.version = 11 : i64} {
  func.func @kernel(%arg0: i32, %arg1: memref<16x128xbf16, #tpu.memory_space<vmem>>, %arg2: memref<128x256xbf16, #tpu.memory_space<vmem>>, %arg3: memref<1x256xf32, #tpu.memory_space<vmem>>, %arg4: memref<256x256xbf16, #tpu.memory_space<vmem>>, %arg5: memref<1x256xf32, #tpu.memory_space<vmem>>, %arg6: memref<256x128xbf16, #tpu.memory_space<vmem>>, %arg7: memref<1x128xf32, #tpu.memory_space<vmem>>, %arg8: memref<16x128xf32, #tpu.memory_space<vmem>>) attributes {dimension_semantics = [#tpu.dimension_semantics<parallel>], iteration_bounds = array<i64: 1>, scalar_prefetch = 0 : i64, scratch_operands = 0 : i64, tpu.core_type = #tpu.core_type<tc>, window_params = [{transform_indices = @transform_0, window_bounds = array<i64: 16, 128>}, {pipeline_mode = #tpu.pipeline_mode<synchronous>, transform_indices = @transform_1, window_bounds = array<i64: 128, 256>}, {pipeline_mode = #tpu.pipeline_mode<synchronous>, transform_indices = @transform_2, window_bounds = array<i64: 1, 256>}, {pipeline_mode = #tpu.pipeline_mode<synchronous>, transform_indices = @transform_3, window_bounds = array<i64: 256, 256>}, {pipeline_mode = #tpu.pipeline_mode<synchronous>, transform_indices = @transform_4, window_bounds = array<i64: 1, 256>}, {pipeline_mode = #tpu.pipeline_mode<synchronous>, transform_indices = @transform_5, window_bounds = array<i64: 256, 128>}, {pipeline_mode = #tpu.pipeline_mode<synchronous>, transform_indices = @transform_6, window_bounds = array<i64: 1, 128>}, {transform_indices = @transform_7, window_bounds = array<i64: 16, 128>}]} {
    %c0 = arith.constant 0 : index
    %c0_0 = arith.constant 0 : index
    %0 = vector.load %arg2[%c0, %c0_0] : memref<128x256xbf16, #tpu.memory_space<vmem>>, vector<128x256xbf16>
    %c0_1 = arith.constant 0 : index
    %c0_2 = arith.constant 0 : index
    %1 = vector.load %arg4[%c0_1, %c0_2] : memref<256x256xbf16, #tpu.memory_space<vmem>>, vector<256x256xbf16>
    %c0_3 = arith.constant 0 : index
    %c0_4 = arith.constant 0 : index
    %2 = vector.load %arg6[%c0_3, %c0_4] : memref<256x128xbf16, #tpu.memory_space<vmem>>, vector<256x128xbf16>
    %c0_5 = arith.constant 0 : index
    %c0_6 = arith.constant 0 : index
    %3 = vector.load %arg3[%c0_5, %c0_6] : memref<1x256xf32, #tpu.memory_space<vmem>>, vector<1x256xf32>
    %c0_7 = arith.constant 0 : index
    %c0_8 = arith.constant 0 : index
    %4 = vector.load %arg5[%c0_7, %c0_8] : memref<1x256xf32, #tpu.memory_space<vmem>>, vector<1x256xf32>
    %c0_9 = arith.constant 0 : index
    %c0_10 = arith.constant 0 : index
    %5 = vector.load %arg7[%c0_9, %c0_10] : memref<1x128xf32, #tpu.memory_space<vmem>>, vector<1x128xf32>
    %c0_11 = arith.constant 0 : index
    %c0_12 = arith.constant 0 : index
    %6 = vector.load %arg1[%c0_11, %c0_12] : memref<16x128xbf16, #tpu.memory_space<vmem>>, vector<16x128xbf16>
    %cst = arith.constant dense<0.000000e+00> : vector<16x256xf32>
    %7 = tpu.matmul %6, %0, %cst {dimension_numbers = #tpu.dot_dimension_numbers<[1], [0], [0], [1], [0, 0, 1, 1], [], []>} : vector<16x128xbf16>, vector<128x256xbf16>, vector<16x256xf32> -> vector<16x256xf32>
    %8 = vector.broadcast %3 : vector<1x256xf32> to vector<16x256xf32>
    %9 = arith.addf %7, %8 : vector<16x256xf32>
    %cst_13 = arith.constant 0.000000e+00 : f32
    %10 = vector.broadcast %cst_13 : f32 to vector<16x256xf32>
    %11 = arith.maximumf %9, %10 : vector<16x256xf32>
    %12 = arith.truncf %11 : vector<16x256xf32> to vector<16x256xbf16>
    %cst_14 = arith.constant dense<0.000000e+00> : vector<16x256xf32>
    %13 = tpu.matmul %12, %1, %cst_14 {dimension_numbers = #tpu.dot_dimension_numbers<[1], [0], [0], [1], [0, 0, 1, 1], [], []>} : vector<16x256xbf16>, vector<256x256xbf16>, vector<16x256xf32> -> vector<16x256xf32>
    %14 = vector.broadcast %4 : vector<1x256xf32> to vector<16x256xf32>
    %15 = arith.addf %13, %14 : vector<16x256xf32>
    %cst_15 = arith.constant 0.000000e+00 : f32
    %16 = vector.broadcast %cst_15 : f32 to vector<16x256xf32>
    %17 = arith.maximumf %15, %16 : vector<16x256xf32>
    %18 = arith.truncf %17 : vector<16x256xf32> to vector<16x256xbf16>
    %cst_16 = arith.constant dense<0.000000e+00> : vector<16x128xf32>
    %19 = tpu.matmul %18, %2, %cst_16 {dimension_numbers = #tpu.dot_dimension_numbers<[1], [0], [0], [1], [0, 0, 1, 1], [], []>} : vector<16x256xbf16>, vector<256x128xbf16>, vector<16x128xf32> -> vector<16x128xf32>
    %20 = vector.broadcast %5 : vector<1x128xf32> to vector<16x128xf32>
    %21 = arith.addf %19, %20 : vector<16x128xf32>
    %c0_17 = arith.constant 0 : index
    %c0_18 = arith.constant 0 : index
    %22 = vector.load %arg8[%c0_17, %c0_18] : memref<16x128xf32, #tpu.memory_space<vmem>>, vector<16x128xf32>
    tpu.vector_store %arg8[%c0_17, %c0_18], %21 {strides = array<i32>} : memref<16x128xf32, #tpu.memory_space<vmem>>, vector<16x128xf32>,
    return
  }
  func.func @transform_0(%arg0: i32) -> (i32, i32) {
    %c0_i32 = arith.constant 0 : i32
    %c0_i32_0 = arith.constant 0 : i32
    return %arg0, %c0_i32 : i32, i32
  }
  func.func @transform_1(%arg0: i32) -> (i32, i32) {
    %c0_i32 = arith.constant 0 : i32
    %c0_i32_0 = arith.constant 0 : i32
    %c0_i32_1 = arith.constant 0 : i32
    return %c0_i32, %c0_i32_0 : i32, i32
  }
  func.func @transform_2(%arg0: i32) -> (i32, i32) {
    %c0_i32 = arith.constant 0 : i32
    %c0_i32_0 = arith.constant 0 : i32
    %c0_i32_1 = arith.constant 0 : i32
    return %c0_i32, %c0_i32_0 : i32, i32
  }
  func.func @transform_3(%arg0: i32) -> (i32, i32) {
    %c0_i32 = arith.constant 0 : i32
    %c0_i32_0 = arith.constant 0 : i32
    %c0_i32_1 = arith.constant 0 : i32
    return %c0_i32, %c0_i32_0 : i32, i32
  }
  func.func @transform_4(%arg0: i32) -> (i32, i32) {
    %c0_i32 = arith.constant 0 : i32
    %c0_i32_0 = arith.constant 0 : i32
    %c0_i32_1 = arith.constant 0 : i32
    return %c0_i32, %c0_i32_0 : i32, i32
  }
  func.func @transform_5(%arg0: i32) -> (i32, i32) {
    %c0_i32 = arith.constant 0 : i32
    %c0_i32_0 = arith.constant 0 : i32
    %c0_i32_1 = arith.constant 0 : i32
    return %c0_i32, %c0_i32_0 : i32, i32
  }
  func.func @transform_6(%arg0: i32) -> (i32, i32) {
    %c0_i32 = arith.constant 0 : i32
    %c0_i32_0 = arith.constant 0 : i32
    %c0_i32_1 = arith.constant 0 : i32
    return %c0_i32, %c0_i32_0 : i32, i32
  }
  func.func @transform_7(%arg0: i32) -> (i32, i32) {
    %c0_i32 = arith.constant 0 : i32
    %c0_i32_0 = arith.constant 0 : i32
    return %arg0, %c0_i32 : i32, i32
  }
}

module attributes {stable_mosaic.version = 11 : i64} {
  func.func @kernel(%arg0: i32, %arg1: memref<16x128xbf16, #tpu.memory_space<vmem>>, %arg2: memref<128x256xbf16, #tpu.memory_space<vmem>>, %arg3: memref<1x256xf32, #tpu.memory_space<vmem>>, %arg4: memref<256x256xbf16, #tpu.memory_space<vmem>>, %arg5: memref<1x256xf32, #tpu.memory_space<vmem>>, %arg6: memref<256x128xbf16, #tpu.memory_space<vmem>>, %arg7: memref<1x128xf32, #tpu.memory_space<vmem>>, %arg8: memref<16x128xf32, #tpu.memory_space<vmem>>) attributes {dimension_semantics = [#tpu.dimension_semantics<parallel>], iteration_bounds = array<i64: 1>, scalar_prefetch = 0 : i64, scratch_operands = 0 : i64, tpu.core_type = #tpu.core_type<tc>, window_params = [{transform_indices = @transform_0, window_bounds = array<i64: 16, 128>}, {pipeline_mode = #tpu.pipeline_mode<synchronous>, transform_indices = @transform_1, window_bounds = array<i64: 128, 256>}, {pipeline_mode = #tpu.pipeline_mode<synchronous>, transform_indices = @transform_2, window_bounds = array<i64: 1, 256>}, {pipeline_mode = #tpu.pipeline_mode<synchronous>, transform_indices = @transform_3, window_bounds = array<i64: 256, 256>}, {pipeline_mode = #tpu.pipeline_mode<synchronous>, transform_indices = @transform_4, window_bounds = array<i64: 1, 256>}, {pipeline_mode = #tpu.pipeline_mode<synchronous>, transform_indices = @transform_5, window_bounds = array<i64: 256, 128>}, {pipeline_mode = #tpu.pipeline_mode<synchronous>, transform_indices = @transform_6, window_bounds = array<i64: 1, 128>}, {transform_indices = @transform_7, window_bounds = array<i64: 16, 128>}]} {
    %c0 = arith.constant 0 : index
    %c0_0 = arith.constant 0 : index
    %0 = vector.load %arg2[%c0, %c0_0] : memref<128x256xbf16, #tpu.memory_space<vmem>>, vector<128x256xbf16>
    %c0_1 = arith.constant 0 : index
    %c0_2 = arith.constant 0 : index
    %1 = vector.load %arg4[%c0_1, %c0_2] : memref<256x256xbf16, #tpu.memory_space<vmem>>, vector<256x256xbf16>
    %c0_3 = arith.constant 0 : index
    %c0_4 = arith.constant 0 : index
    %2 = vector.load %arg6[%c0_3, %c0_4] : memref<256x128xbf16, #tpu.memory_space<vmem>>, vector<256x128xbf16>
    %c0_5 = arith.constant 0 : index
    %c0_6 = arith.constant 0 : index
    %3 = vector.load %arg3[%c0_5, %c0_6] : memref<1x256xf32, #tpu.memory_space<vmem>>, vector<1x256xf32>
    %c0_7 = arith.constant 0 : index
    %c0_8 = arith.constant 0 : index
    %4 = vector.load %arg5[%c0_7, %c0_8] : memref<1x256xf32, #tpu.memory_space<vmem>>, vector<1x256xf32>
    %c0_9 = arith.constant 0 : index
    %c0_10 = arith.constant 0 : index
    %5 = vector.load %arg7[%c0_9, %c0_10] : memref<1x128xf32, #tpu.memory_space<vmem>>, vector<1x128xf32>
    %c0_11 = arith.constant 0 : index
    %c0_12 = arith.constant 0 : index
    %6 = vector.load %arg1[%c0_11, %c0_12] : memref<16x128xbf16, #tpu.memory_space<vmem>>, vector<16x128xbf16>
    %cst = arith.constant dense<0.000000e+00> : vector<16x256xf32>
    %7 = tpu.matmul %6, %0, %cst {dimension_numbers = #tpu.dot_dimension_numbers<[1], [0], [0], [1], [0, 0, 1, 1], [], []>} : vector<16x128xbf16>, vector<128x256xbf16>, vector<16x256xf32> -> vector<16x256xf32>
    %8 = vector.broadcast %3 : vector<1x256xf32> to vector<16x256xf32>
    %9 = arith.addf %7, %8 : vector<16x256xf32>
    %cst_13 = arith.constant 0.000000e+00 : f32
    %10 = vector.broadcast %cst_13 : f32 to vector<16x256xf32>
    %11 = arith.maximumf %9, %10 : vector<16x256xf32>
    %12 = arith.truncf %11 : vector<16x256xf32> to vector<16x256xbf16>
    %cst_14 = arith.constant dense<0.000000e+00> : vector<16x256xf32>
    %13 = tpu.matmul %12, %1, %cst_14 {dimension_numbers = #tpu.dot_dimension_numbers<[1], [0], [0], [1], [0, 0, 1, 1], [], []>} : vector<16x256xbf16>, vector<256x256xbf16>, vector<16x256xf32> -> vector<16x256xf32>
    %14 = vector.broadcast %4 : vector<1x256xf32> to vector<16x256xf32>
    %15 = arith.addf %13, %14 : vector<16x256xf32>
    %cst_15 = arith.constant 0.000000e+00 : f32
    %16 = vector.broadcast %cst_15 : f32 to vector<16x256xf32>
    %17 = arith.maximumf %15, %16 : vector<16x256xf32>
    %18 = arith.truncf %17 : vector<16x256xf32> to vector<16x256xbf16>
    %cst_16 = arith.constant dense<0.000000e+00> : vector<16x128xf32>
    %19 = tpu.matmul %18, %2, %cst_16 {dimension_numbers = #tpu.dot_dimension_numbers<[1], [0], [0], [1], [0, 0, 1, 1], [], []>} : vector<16x256xbf16>, vector<256x128xbf16>, vector<16x128xf32> -> vector<16x128xf32>
    %20 = vector.broadcast %5 : vector<1x128xf32> to vector<16x128xf32>
    %21 = arith.addf %19, %20 : vector<16x128xf32>
    %c0_17 = arith.constant 0 : index
    %c0_18 = arith.constant 0 : index
    %22 = vector.load %arg8[%c0_17, %c0_18] : memref<16x128xf32, #tpu.memory_space<vmem>>, vector<16x128xf32>
    tpu.vector_store %arg8[%c0_17, %c0_18], %21 {strides = array<i32>} : memref<16x128xf32, #tpu.memory_space<vmem>>, vector<16x128xf32>,
    return
  }
  func.func @transform_0(%arg0: i32) -> (i32, i32) {
    %c0_i32 = arith.constant 0 : i32
    %c0_i32_0 = arith.constant 0 : i32
    return %arg0, %c0_i32 : i32, i32
  }
  func.func @transform_1(%arg0: i32) -> (i32, i32) {
    %c0_i32 = arith.constant 0 : i32
    %c0_i32_0 = arith.constant 0 : i32
    %c0_i32_1 = arith.constant 0 : i32
    return %c0_i32, %c0_i32_0 : i32, i32
  }
  func.func @transform_2(%arg0: i32) -> (i32, i32) {
    %c0_i32 = arith.constant 0 : i32
    %c0_i32_0 = arith.constant 0 : i32
    %c0_i32_1 = arith.constant 0 : i32
    return %c0_i32, %c0_i32_0 : i32, i32
  }
  func.func @transform_3(%arg0: i32) -> (i32, i32) {
    %c0_i32 = arith.constant 0 : i32
    %c0_i32_0 = arith.constant 0 : i32
    %c0_i32_1 = arith.constant 0 : i32
    return %c0_i32, %c0_i32_0 : i32, i32
  }
  func.func @transform_4(%arg0: i32) -> (i32, i32) {
    %c0_i32 = arith.constant 0 : i32
    %c0_i32_0 = arith.constant 0 : i32
    %c0_i32_1 = arith.constant 0 : i32
    return %c0_i32, %c0_i32_0 : i32, i32
  }
  func.func @transform_5(%arg0: i32) -> (i32, i32) {
    %c0_i32 = arith.constant 0 : i32
    %c0_i32_0 = arith.constant 0 : i32
    %c0_i32_1 = arith.constant 0 : i32
    return %c0_i32, %c0_i32_0 : i32, i32
  }
  func.func @transform_6(%arg0: i32) -> (i32, i32) {
    %c0_i32 = arith.constant 0 : i32
    %c0_i32_0 = arith.constant 0 : i32
    %c0_i32_1 = arith.constant 0 : i32
    return %c0_i32, %c0_i32_0 : i32, i32
  }
  func.func @transform_7(%arg0: i32) -> (i32, i32) {
    %c0_i32 = arith.constant 0 : i32
    %c0_i32_0 = arith.constant 0 : i32
    return %arg0, %c0_i32 : i32, i32
  }
}

</mosaic_0001>

<bundles_post_ra>
// kernel: tpu_custom_call.1
= control target key start
LH: loop header
LB: loop body
LE: loop exit
PB: predicated region body
PF: predicated region fallthrough
CT: control target
= control target key end

     0   :  { %12 = vsyncpa [#allocation3], 0  ;;  %s1076_s0 = inlined_call_operand.hbm [shape: bf16[16,128], index: 0, kind: input, shape index: {}]   ;;  %s1077_s1 = inlined_call_operand.hbm [shape: bf16[128,256], index: 1, kind: input, shape index: {}]   ;;  %s1078_s2 = inlined_call_operand.vmem [shape: f32[1,256], index: 2, kind: input, shape index: {}]   ;;  %s1079_s3 = inlined_call_operand.hbm [shape: bf16[256,256], index: 3, kind: input, shape index: {}]   ;;  %s1080_s4 = inlined_call_operand.vmem [shape: f32[1,256], index: 4, kind: input, shape index: {}]   ;;  %s1081_s5 = inlined_call_operand.hbm [shape: bf16[256,128], index: 5, kind: input, shape index: {}]   ;;  %s1082_s6 = inlined_call_operand.vmem [shape: f32[1,128], index: 6, kind: input, shape index: {}]   ;;  %s1083_s7 = inlined_call_operand.hbm [shape: f32[16,128], index: 7, kind: output, shape index: {}]  }
   0x1   :  { %13 = vsyncpa [#allocation6], 0 }
   0x2   :  { %14 = vsyncpa [#allocation9], 0 }
   0x3   :  { %15 = vsyncpa [#allocation4], 0  ;;  %s993_s24 = smov [#allocation5]  }
   0x4   :  { %s33_s25 = sshll.u32 %s993_s24, 4  ;;  %s34_s25 = int_to_ptr.vmem [resolvable:$true] %s33_s25 }
   0x5   :  { %s893_s26 = scalar_lea.vmem %s34_s25, 2048  ;;  %p898_p1 = scmp.lt.s32.totalorder %s34_s25, %s34_s25 }
   0x6   :  { %p894_p0 = scmp.ne.s32.totalorder %s34_s25, %s893_s26  ;;  %p899_p2 = scmp.lt.s32.totalorder %s893_s26, %s893_s26 }
   0x8   :  { %p900_p3 = por %p899_p2, %p898_p1 }
   0xa   :  { %p901_p4 = pnand %p900_p3, %p894_p0 }
   0xc   :  { %904 = shalt.err (!%p901_p4)
}
   0xd   :  { %s994_s27 = smov 128   ;;  %s995_s28 = smov 8  }
   0xe   :  { %39 = dma.hbm_to_vmem [thread:$0]  %s1077_s1, 2048, %s34_s25, [#allocation6], %s994_s27, %s994_s27, %s995_s28  }
   0xf   :  { %s996_s8 = smov [#allocation2]  }
  0x10   :  { %s21_s9 = sshll.u32 %s996_s8, 4  ;;  %s22_s9 = int_to_ptr.vmem [resolvable:$true] %s21_s9 }
  0x11   :  { %s913_s10 = scalar_lea.vmem %s22_s9, 128  ;;  %p918_p6 = scmp.lt.s32.totalorder %s22_s9, %s22_s9 }
  0x12   :  { %p914_p5 = scmp.ne.s32.totalorder %s22_s9, %s913_s10  ;;  %p919_p7 = scmp.lt.s32.totalorder %s913_s10, %s913_s10 }
  0x14   :  { %p920_p8 = por %p919_p7, %p918_p6 }
  0x16   :  { %p921_p9 = pnand %p920_p8, %p914_p5 }
  0x18   :  { %924 = shalt.err (!%p921_p9)
}
  0x19   :  { %s997_s11 = smov 64   ;;  %s998_s12 = smov 4  }
  0x1a   :  { %27 = dma.hbm_to_vmem [thread:$0]  %s1076_s0, 128, %s22_s9, [#allocation3], %s997_s11, %s997_s11, %s998_s12  }
  0x1b   :  { %s999_s15 = smov [#allocation7]   ;;  %s1000_s17 = smov [#allocation8]  }
  0x1c   :  { %s47_s16 = sshll.u32 %s999_s15, 4  ;;  %s61_s1 = sshll.u32 %s1000_s17, 4  ;;  %s48_s16 = int_to_ptr.vmem [resolvable:$true] %s47_s16  ;;  %s62_s1 = int_to_ptr.vmem [resolvable:$true] %s61_s1 }
  0x1d   :  { %s933_s18 = scalar_lea.vmem %s48_s16, 4096  ;;  %p938_p11 = scmp.lt.s32.totalorder %s48_s16, %s48_s16 }
  0x1e   :  { %p934_p10 = scmp.ne.s32.totalorder %s48_s16, %s933_s18  ;;  %p939_p12 = scmp.lt.s32.totalorder %s933_s18, %s933_s18 }
  0x20   :  { %p940_p13 = por %p939_p12, %p938_p11 }
  0x22   :  { %p941_p0 = pnand %p940_p13, %p934_p10 }
  0x24   :  { %944 = shalt.err (!%p941_p0)
}
  0x25   :  { %53 = dma.hbm_to_vmem [thread:$0]  %s1079_s3, 4096, %s48_s16, [#allocation6], %s994_s27, %s994_s27, %s995_s28  }
  0x26   :  { %s953_s0 = scalar_lea.vmem %s62_s1, 2048  ;;  %p958_p2 = scmp.lt.s32.totalorder %s62_s1, %s62_s1 }
  0x27   :  { %p954_p1 = scmp.ne.s32.totalorder %s62_s1, %s953_s0  ;;  %p959_p3 = scmp.lt.s32.totalorder %s953_s0, %s953_s0 }
  0x29   :  { %p960_p4 = por %p959_p3, %p958_p2 }
  0x2b   :  { %p961_p5 = pnand %p960_p4, %p954_p1 }
  0x2d   :  { %964 = shalt.err (!%p961_p5)
}
  0x2e   :  { %67 = dma.hbm_to_vmem [thread:$0]  %s1081_s5, 2048, %s62_s1, [#allocation9], %s997_s11, %s997_s11, %s998_s12  }
  0x2f   :  { %985 = dma.done.wait [#allocation3], 128  }
  0x30   :  { %986 = vsyncadd [#allocation3], 4294967168 }
  0x31   :  { %987 = dma.done.wait [#allocation6], 6144  }
  0x32   :  { %988 = vsyncadd [#allocation6], 4294961152 }
  0x33   :  { %989 = dma.done.wait [#allocation9], 2048  }
  0x34   :  { %990 = vsyncadd [#allocation9], 4294965248  ;;  %v1001_v0 = vmov 0   ;;  %v796_v1 = vld [vmem:[#allocation5 + $0x74] ss:$8 sps:$4 sm:$0xff]   ;;  %v873_v54 = vld [vmem:[#allocation8 + $0x68] sm:$0xff]   ;;  %v169_v60 = vlaneseq }
  0x35   :  { %297 = vmatprep.mubr.bf16.mxu0 %v1001_v0  ;;  %v798_v2 = vld [vmem:[#allocation5 + $0x70] ss:$8 sps:$4 sm:$0xff]   ;;  %265 = vmatprep.subr.bf16.mxu0 %v796_v1  ;;  %v799_v3 = vld [vmem:[#allocation5 + $0x64] ss:$8 sps:$4 sm:$0xff]   ;;  %v801_v4 = vld [vmem:[#allocation5 + $0x60] ss:$8 sps:$4 sm:$0xff]  }
  0x36   :  { %266 = vmatpush1.bf16.msra.mxu0 %v798_v2  ;;  %v802_v5 = vld [vmem:[#allocation5 + $0x54] ss:$8 sps:$4 sm:$0xff]   ;;  %v804_v6 = vld [vmem:[#allocation5 + $0x50] ss:$8 sps:$4 sm:$0xff]   ;;  %v805_v7 = vld [vmem:[#allocation5 + $0x44] ss:$8 sps:$4 sm:$0xff]  }
  0x37   :  { %267 = vmatprep.subr.bf16.mxu0 %v799_v3  ;;  %v807_v8 = vld [vmem:[#allocation5 + $0x40] ss:$8 sps:$4 sm:$0xff]   ;;  %v808_v9 = vld [vmem:[#allocation5 + $0x34] ss:$8 sps:$4 sm:$0xff]   ;;  %v823_v11 = vld [vmem:[#allocation7 + $0x70] ss:$8 sps:$4 sm:$0xff]  }
  0x38   :  { %v821_v10 = vld [vmem:[#allocation7 + $0x74] ss:$8 sps:$4 sm:$0xff]   ;;  %v824_v12 = vld [vmem:[#allocation7 + $0x64] ss:$8 sps:$4 sm:$0xff]   ;;  %v810_v13 = vld [vmem:[#allocation5 + $0x30] ss:$8 sps:$4 sm:$0xff]  }
  0x39   :  { %485 = vmatprep.subr.bf16.mxu1 %v821_v10  ;;  %v826_v14 = vld [vmem:[#allocation7 + $0x60] ss:$8 sps:$4 sm:$0xff]   ;;  %v811_v15 = vld [vmem:[#allocation5 + $0x24] ss:$8 sps:$4 sm:$0xff]   ;;  %v827_v16 = vld [vmem:[#allocation7 + $0x54] ss:$8 sps:$4 sm:$0xff]  }
  0x3a   :  { %268 = vmatpush1.bf16.msra.mxu0 %v801_v4  ;;  %486 = vmatpush1.bf16.msra.mxu1 %v823_v11  ;;  %v813_v17 = vld [vmem:[#allocation5 + $0x20] ss:$8 sps:$4 sm:$0xff]   ;;  %v829_v18 = vld [vmem:[#allocation7 + $0x50] ss:$8 sps:$4 sm:$0xff]   ;;  %v814_v19 = vld [vmem:[#allocation5 + $0x14] ss:$8 sps:$4 sm:$0xff]  }
  0x3b   :  { %269 = vmatprep.subr.bf16.mxu0 %v802_v5  ;;  %487 = vmatprep.subr.bf16.mxu1 %v824_v12  ;;  %v830_v20 = vld [vmem:[#allocation7 + $0x44] ss:$8 sps:$4 sm:$0xff]   ;;  %v816_v21 = vld [vmem:[#allocation5 + $0x10] ss:$8 sps:$4 sm:$0xff]   ;;  %v832_v22 = vld [vmem:[#allocation7 + $0x40] ss:$8 sps:$4 sm:$0xff]  }
  0x3c   :  { %v817_v23 = vld [vmem:[#allocation5 + $0x4] ss:$8 sps:$4 sm:$0xff]   ;;  %v833_v24 = vld [vmem:[#allocation7 + $0x34] ss:$8 sps:$4 sm:$0xff]   ;;  %v819_v25 = vld [vmem:[#allocation5] ss:$8 sps:$4 sm:$0xff]  }
  0x3d   :  { %v835_v26 = vld [vmem:[#allocation7 + $0x30] ss:$8 sps:$4 sm:$0xff]   ;;  %v836_v28 = vld [vmem:[#allocation7 + $0x24] ss:$8 sps:$4 sm:$0xff]   ;;  %v838_v29 = vld [vmem:[#allocation7 + $0x20] ss:$8 sps:$4 sm:$0xff]  }
  0x3e   :  { %270 = vmatpush1.bf16.msra.mxu0 %v804_v6  ;;  %488 = vmatpush1.bf16.msra.mxu1 %v826_v14  ;;  %v820_v27 = vld [vmem:[#allocation2] sm:$0xff]   ;;  %v842_v32 = vld [vmem:[#allocation7 + $0x4] ss:$8 sps:$4 sm:$0xff]   ;;  %v844_v33 = vld [vmem:[#allocation7] ss:$8 sps:$4 sm:$0xff]   ;;  %v170_v61 = vshrl.u32 %v169_v60, 7 }
  0x3f   :  { %271 = vmatprep.subr.bf16.mxu0 %v805_v7  ;;  %489 = vmatprep.subr.bf16.mxu1 %v827_v16  ;;  %v839_v30 = vld [vmem:[#allocation7 + $0x14] ss:$8 sps:$4 sm:$0xff]   ;;  %v841_v31 = vld [vmem:[#allocation7 + $0x10] ss:$8 sps:$4 sm:$0xff]   ;;  %v848_v36 = vld [vmem:[#allocation7 + $0xe4] ss:$8 sps:$4 sm:$0xff]  }
  0x40   :  { %v845_v34 = vld [vmem:[#allocation7 + $0xf4] ss:$8 sps:$4 sm:$0xff]   ;;  %v847_v35 = vld [vmem:[#allocation7 + $0xf0] ss:$8 sps:$4 sm:$0xff]   ;;  %v850_v37 = vld [vmem:[#allocation7 + $0xe0] ss:$8 sps:$4 sm:$0xff]  }
  0x41   :  { %v851_v38 = vld [vmem:[#allocation7 + $0xd4] ss:$8 sps:$4 sm:$0xff]   ;;  %v853_v39 = vld [vmem:[#allocation7 + $0xd0] ss:$8 sps:$4 sm:$0xff]   ;;  %v854_v40 = vld [vmem:[#allocation7 + $0xc4] ss:$8 sps:$4 sm:$0xff]  }
  0x42   :  { %272 = vmatpush1.bf16.msra.mxu0 %v807_v8  ;;  %490 = vmatpush1.bf16.msra.mxu1 %v829_v18  ;;  %v856_v41 = vld [vmem:[#allocation7 + $0xc0] ss:$8 sps:$4 sm:$0xff]   ;;  %v857_v42 = vld [vmem:[#allocation7 + $0xb4] ss:$8 sps:$4 sm:$0xff]   ;;  %v859_v43 = vld [vmem:[#allocation7 + $0xb0] ss:$8 sps:$4 sm:$0xff]  }
  0x43   :  { %273 = vmatprep.subr.bf16.mxu0 %v808_v9  ;;  %491 = vmatprep.subr.bf16.mxu1 %v830_v20  ;;  %v860_v44 = vld [vmem:[#allocation7 + $0xa4] ss:$8 sps:$4 sm:$0xff]   ;;  %v862_v45 = vld [vmem:[#allocation7 + $0xa0] ss:$8 sps:$4 sm:$0xff]   ;;  %v863_v46 = vld [vmem:[#allocation7 + $0x94] ss:$8 sps:$4 sm:$0xff]  }
  0x44   :  { %v865_v47 = vld [vmem:[#allocation7 + $0x90] ss:$8 sps:$4 sm:$0xff]   ;;  %v866_v48 = vld [vmem:[#allocation7 + $0x84] ss:$8 sps:$4 sm:$0xff]   ;;  %v868_v49 = vld [vmem:[#allocation7 + $0x80] ss:$8 sps:$4 sm:$0xff]  }
  0x45   :  { %v869_v50 = vld [vmem:[#allocation8 + $0x78] sm:$0xff]   ;;  %v871_v52 = vld [vmem:[#allocation8 + $0x70] sm:$0xff]   ;;  %v874_v55 = vld [vmem:[#allocation8 + $0x28] sm:$0xff]   ;;  %v175_v62 = vsub.s32 1, %v170_v61  ;;  %v171_v63 = vsub.s32 0, %v170_v61  ;;  %s1002_s25 = smov [#allocation10]  }
  0x46   :  { %274 = vmatpush1.bf16.msra.mxu0 %v810_v13  ;;  %492 = vmatpush1.bf16.msra.mxu1 %v832_v22  ;;  %v870_v51 = vld [vmem:[#allocation8 + $0x38] sm:$0xff]   ;;  %v872_v53 = vld [vmem:[#allocation8 + $0x30] sm:$0xff]   ;;  %v875_v56 = vld [vmem:[#allocation8 + $0x60] sm:$0xff]   ;;  %s684_s26 = sshll.u32 %s1002_s25, 4  ;;  %s685_s26 = int_to_ptr.vmem [resolvable:$true] %s684_s26 }
  0x47   :  { %275 = vmatprep.subr.bf16.mxu0 %v811_v15  ;;  %493 = vmatprep.subr.bf16.mxu1 %v833_v24  ;;  %v876_v57 = vld [vmem:[#allocation8 + $0x20] sm:$0xff]   ;;  %v877_v58 = vld [vmem:[#allocation8 + $0x58] sm:$0xff]   ;;  %v880_v18 = vld [vmem:[#allocation8 + $0x10] sm:$0xff]   ;;  %s965_s29 = scalar_lea.vmem %s685_s26, 256  ;;  %p970_p7 = scmp.lt.s32.totalorder %s685_s26, %s685_s26 }
  0x48   :  { %v878_v59 = vld [vmem:[#allocation8 + $0x18] sm:$0xff]   ;;  %v882_v20 = vld [vmem:[#allocation8 + $0x8] sm:$0xff]   ;;  %v884_v22 = vld [vmem:[#allocation8] sm:$0xff]   ;;  %p966_p6 = scmp.ne.s32.totalorder %s685_s26, %s965_s29  ;;  %p971_p8 = scmp.lt.s32.totalorder %s965_s29, %s965_s29 }
  0x49   :  { %v163_v0 = vld [vmem:[%s1078_s2] sm:$0x3] }
  0x4a   :  { %276 = vmatpush1.bf16.msra.mxu0 %v813_v17  ;;  %494 = vmatpush1.bf16.msra.mxu1 %v835_v26  ;;  %v176_v2 = vrot.slane %v163_v0, %v175_v62  ;;  %v172_v3 = vrot.slane %v163_v0, %v171_v63  ;;  %v879_v17 = vld [vmem:[#allocation8 + $0x50] sm:$0xff]   ;;  %p972_p9 = por %p971_p8, %p970_p7 }
  0x4b   :  { %277 = vmatprep.subr.bf16.mxu0 %v814_v19  ;;  %495 = vmatprep.subr.bf16.mxu1 %v836_v28  ;;  %v881_v19 = vld [vmem:[#allocation8 + $0x48] sm:$0xff]  }
  0x4c   :  { %p973_p10 = pnand %p972_p9, %p966_p6 }
  0x4e   :  { %278 = vmatpush1.bf16.msra.mxu0 %v816_v21  ;;  %496 = vmatpush1.bf16.msra.mxu1 %v838_v29  ;;  %v883_v21 = vld [vmem:[#allocation8 + $0x40] sm:$0xff]  }
  0x4f   :  { %279 = vmatprep.subr.bf16.mxu0 %v817_v23  ;;  %497 = vmatprep.subr.bf16.mxu1 %v839_v30  ;;  %v164_v23 = vld [vmem:[%s1080_s4] sm:$0x3] }
  0x50   :  { %v318_v26 = vrot.slane %v164_v23, %v171_v63 }
  0x52   :  { %280 = vmatpush1.bf16.msra.mxu0 %v819_v25  ;;  %498 = vmatpush1.bf16.msra.mxu1 %v841_v31  ;;  %v322_v25 = vrot.slane %v164_v23, %v175_v62 }
  0x53   :  { %499 = vmatprep.subr.bf16.mxu1 %v842_v32  ;;  %764 = vmatprep.subr.bf16.mxu0 %v869_v50 }
  0x55   :  { %298 = vmatmul.mubr.bf16.vlgmr.msra.gmra.mxu0 %v820_v27 }
  0x56   :  { %500 = vmatpush1.bf16.msra.mxu1 %v844_v33  ;;  %765 = vmatpush3.bf16.msra.mxu0 %v870_v51 }
  0x57   :  { %501 = vmatprep.subr.bf16.mxu1 %v845_v34  ;;  %766 = vmatprep.subr.bf16.mxu0 %v871_v52 }
  0x5a   :  { %502 = vmatpush2.bf16.msra.mxu1 %v847_v35  ;;  %767 = vmatpush3.bf16.msra.mxu0 %v872_v53 }
  0x5b   :  { %503 = vmatprep.subr.bf16.mxu1 %v848_v36  ;;  %768 = vmatprep.subr.bf16.mxu0 %v873_v54 }
  0x5e   :  { %504 = vmatpush2.bf16.msra.mxu1 %v850_v37  ;;  %769 = vmatpush3.bf16.msra.mxu0 %v874_v55 }
  0x5f   :  { %505 = vmatprep.subr.bf16.mxu1 %v851_v38  ;;  %770 = vmatprep.subr.bf16.mxu0 %v875_v56 }
  0x62   :  { %506 = vmatpush2.bf16.msra.mxu1 %v853_v39  ;;  %771 = vmatpush3.bf16.msra.mxu0 %v876_v57 }
  0x63   :  { %507 = vmatprep.subr.bf16.mxu1 %v854_v40  ;;  %772 = vmatprep.subr.bf16.mxu0 %v877_v58 }
  0x66   :  { %508 = vmatpush2.bf16.msra.mxu1 %v856_v41  ;;  %773 = vmatpush3.bf16.msra.mxu0 %v878_v59  ;;  %v747_v41 = vld [vmem:[%s1082_s6] ss:$0 sm:$0xff] }
  0x67   :  { %509 = vmatprep.subr.bf16.mxu1 %v857_v42  ;;  %774 = vmatprep.subr.bf16.mxu0 %v879_v17 }
  0x6a   :  { %510 = vmatpush2.bf16.msra.mxu1 %v859_v43  ;;  %775 = vmatpush3.bf16.msra.mxu0 %v880_v18 }
  0x6b   :  { %511 = vmatprep.subr.bf16.mxu1 %v860_v44  ;;  %776 = vmatprep.subr.bf16.mxu0 %v881_v19 }
  0x6e   :  { %512 = vmatpush2.bf16.msra.mxu1 %v862_v45  ;;  %777 = vmatpush3.bf16.msra.mxu0 %v882_v20 }
  0x6f   :  { %513 = vmatprep.subr.bf16.mxu1 %v863_v46  ;;  %778 = vmatprep.subr.bf16.mxu0 %v883_v21 }
  0x72   :  { %514 = vmatpush2.bf16.msra.mxu1 %v865_v47  ;;  %779 = vmatpush3.bf16.msra.mxu0 %v884_v22 }
  0x73   :  { %515 = vmatprep.subr.bf16.mxu1 %v866_v48 }
  0x76   :  { %516 = vmatpush2.bf16.msra.mxu1 %v868_v49 }
 0x115   :  { %v299_v1 = vpop.f32.mrf.mxu0 }
 0x116   :  { %v300_v8 = vadd.f32 %v299_v1, %v172_v3 }
 0x117   :  { %v301_v4 = vpop.f32.mrf.mxu0 }
 0x118   :  { %v302_v6 = vadd.f32 %v301_v4, %v176_v2  ;;  %v308_v14 = vmax.f32 %v300_v8, 0.0 }
 0x119   :  { %v303_v5 = vpop.f32.mrf.mxu0 }
 0x11a   :  { %v304_v7 = vadd.f32 %v303_v5, %v172_v3  ;;  %v309_v12 = vmax.f32 %v302_v6, 0.0 }
 0x11b   :  { %v305_v9 = vpop.f32.mrf.mxu0 }
 0x11c   :  { %v306_v10 = vadd.f32 %v305_v9, %v176_v2  ;;  %v310_v11 = vmax.f32 %v304_v7, 0.0 }
 0x11e   :  { %v311_v13 = vmax.f32 %v306_v10, 0.0  ;;  %v312_v16 = vpack.c.bf16 %v310_v11, %v308_v14 }
 0x120   :  { %v313_v15 = vpack.c.bf16 %v311_v13, %v309_v12 }
 0x122   :  { %517 = vmatprep.mubr.bf16.mxu1 %v313_v15 }
 0x123   :  { %518 = vmatmul.mubr.bf16.vlgmr.msra.gmra.mxu1 %v312_v16 }
 0x1e3   :  { %v519_v24 = vpop.f32.mrf.mxu1 }
 0x1e4   :  { %v520_v31 = vadd.f32 %v519_v24, %v318_v26 }
 0x1e5   :  { %v521_v27 = vpop.f32.mrf.mxu1 }
 0x1e6   :  { %v522_v29 = vadd.f32 %v521_v27, %v322_v25  ;;  %v528_v37 = vmax.f32 %v520_v31, 0.0 }
 0x1e7   :  { %v523_v28 = vpop.f32.mrf.mxu1 }
 0x1e8   :  { %v524_v30 = vadd.f32 %v523_v28, %v318_v26  ;;  %v529_v35 = vmax.f32 %v522_v29, 0.0 }
 0x1e9   :  { %v525_v32 = vpop.f32.mrf.mxu1 }
 0x1ea   :  { %v526_v33 = vadd.f32 %v525_v32, %v322_v25  ;;  %v530_v34 = vmax.f32 %v524_v30, 0.0 }
 0x1ec   :  { %v531_v36 = vmax.f32 %v526_v33, 0.0  ;;  %v532_v39 = vpack.c.bf16 %v530_v34, %v528_v37 }
 0x1ee   :  { %v533_v38 = vpack.c.bf16 %v531_v36, %v529_v35 }
 0x1f0   :  { %668 = vmatprep.mubr.bf16.mxu0 %v533_v38 }
 0x1f1   :  { %669 = vmatmul.mubr.bf16.vlgmr.msra.gmra.mxu0 %v532_v39 }
 0x2b1   :  { %v780_v40 = vpop.f32.mrf.mxu0 }
 0x2b3   :  { %v781_v42 = vpop.f32.mrf.mxu0 }
 0x2b4   :  { %v782_v43 = vadd.f32 %v781_v42, %v780_v40 }
 0x2b5   :  { %v783_v44 = vpop.f32.mrf.mxu0 }
 0x2b6   :  { %v671_v45 = vadd.f32 %v782_v43, %v747_v41 }
 0x2b7   :  { %v784_v46 = vpop.f32.mrf.mxu0 }
 0x2b8   :  { %677 = vst [vmem:[#allocation10] sm:$0xff] %v671_v45  ;;  %v785_v47 = vadd.f32 %v784_v46, %v783_v44 }
 0x2ba   :  { %v674_v48 = vadd.f32 %v785_v47, %v747_v41 }
 0x2bc   :  { %678 = vst [vmem:[#allocation10 + $0x8] sm:$0xff] %v674_v48 }
 0x2bd   :  { %976 = shalt.err (!%p973_p10)
}
 0x2be   :  { %690 = dma.vmem_to_hbm [thread:$0]  %s685_s26, 256, %s1083_s7, [#allocation4], %s994_s27, %s994_s27, %s995_s28  }
 0x2bf   :  { %991 = dma.done.wait [#allocation4], 256  }
 0x2c0   :  { %992 = vsyncadd [#allocation4], 4294967040 }
 0x2c1   :  { %694 = vsyncpa [#allocation3], 1 }
 0x2c2   :  { %695 = vsyncpa [#allocation6], 1 }
 0x2c3   :  { %696 = vsyncpa [#allocation9], 1 }
 0x2c4   :  { %697 = vsyncpa [#allocation4], 1 }

// kernel: tpu_custom_call.1
= control target key start
LH: loop header
LB: loop body
LE: loop exit
PB: predicated region body
PF: predicated region fallthrough
CT: control target
= control target key end

     0   :  { %12 = vsyncpa [#allocation3], 0  ;;  %s1076_s0 = inlined_call_operand.hbm [shape: bf16[16,128], index: 0, kind: input, shape index: {}]   ;;  %s1077_s1 = inlined_call_operand.hbm [shape: bf16[128,256], index: 1, kind: input, shape index: {}]   ;;  %s1078_s2 = inlined_call_operand.vmem [shape: f32[1,256], index: 2, kind: input, shape index: {}]   ;;  %s1079_s3 = inlined_call_operand.hbm [shape: bf16[256,256], index: 3, kind: input, shape index: {}]   ;;  %s1080_s4 = inlined_call_operand.vmem [shape: f32[1,256], index: 4, kind: input, shape index: {}]   ;;  %s1081_s5 = inlined_call_operand.hbm [shape: bf16[256,128], index: 5, kind: input, shape index: {}]   ;;  %s1082_s6 = inlined_call_operand.vmem [shape: f32[1,128], index: 6, kind: input, shape index: {}]   ;;  %s1083_s7 = inlined_call_operand.hbm [shape: f32[16,128], index: 7, kind: output, shape index: {}]  }
   0x1   :  { %13 = vsyncpa [#allocation6], 0 }
   0x2   :  { %14 = vsyncpa [#allocation9], 0 }
   0x3   :  { %15 = vsyncpa [#allocation4], 0  ;;  %s993_s24 = smov [#allocation5]  }
   0x4   :  { %s33_s25 = sshll.u32 %s993_s24, 4  ;;  %s34_s25 = int_to_ptr.vmem [resolvable:$true] %s33_s25 }
   0x5   :  { %s893_s26 = scalar_lea.vmem %s34_s25, 2048  ;;  %p898_p1 = scmp.lt.s32.totalorder %s34_s25, %s34_s25 }
   0x6   :  { %p894_p0 = scmp.ne.s32.totalorder %s34_s25, %s893_s26  ;;  %p899_p2 = scmp.lt.s32.totalorder %s893_s26, %s893_s26 }
   0x8   :  { %p900_p3 = por %p899_p2, %p898_p1 }
   0xa   :  { %p901_p4 = pnand %p900_p3, %p894_p0 }
   0xc   :  { %904 = shalt.err (!%p901_p4)
}
   0xd   :  { %s994_s27 = smov 128   ;;  %s995_s28 = smov 8  }
   0xe   :  { %39 = dma.hbm_to_vmem [thread:$0]  %s1077_s1, 2048, %s34_s25, [#allocation6], %s994_s27, %s994_s27, %s995_s28  }
   0xf   :  { %s996_s8 = smov [#allocation2]  }
  0x10   :  { %s21_s9 = sshll.u32 %s996_s8, 4  ;;  %s22_s9 = int_to_ptr.vmem [resolvable:$true] %s21_s9 }
  0x11   :  { %s913_s10 = scalar_lea.vmem %s22_s9, 128  ;;  %p918_p6 = scmp.lt.s32.totalorder %s22_s9, %s22_s9 }
  0x12   :  { %p914_p5 = scmp.ne.s32.totalorder %s22_s9, %s913_s10  ;;  %p919_p7 = scmp.lt.s32.totalorder %s913_s10, %s913_s10 }
  0x14   :  { %p920_p8 = por %p919_p7, %p918_p6 }
  0x16   :  { %p921_p9 = pnand %p920_p8, %p914_p5 }
  0x18   :  { %924 = shalt.err (!%p921_p9)
}
  0x19   :  { %s997_s11 = smov 64   ;;  %s998_s12 = smov 4  }
  0x1a   :  { %27 = dma.hbm_to_vmem [thread:$0]  %s1076_s0, 128, %s22_s9, [#allocation3], %s997_s11, %s997_s11, %s998_s12  }
  0x1b   :  { %s999_s15 = smov [#allocation7]   ;;  %s1000_s17 = smov [#allocation8]  }
  0x1c   :  { %s47_s16 = sshll.u32 %s999_s15, 4  ;;  %s61_s1 = sshll.u32 %s1000_s17, 4  ;;  %s48_s16 = int_to_ptr.vmem [resolvable:$true] %s47_s16  ;;  %s62_s1 = int_to_ptr.vmem [resolvable:$true] %s61_s1 }
  0x1d   :  { %s933_s18 = scalar_lea.vmem %s48_s16, 4096  ;;  %p938_p11 = scmp.lt.s32.totalorder %s48_s16, %s48_s16 }
  0x1e   :  { %p934_p10 = scmp.ne.s32.totalorder %s48_s16, %s933_s18  ;;  %p939_p12 = scmp.lt.s32.totalorder %s933_s18, %s933_s18 }
  0x20   :  { %p940_p13 = por %p939_p12, %p938_p11 }
  0x22   :  { %p941_p0 = pnand %p940_p13, %p934_p10 }
  0x24   :  { %944 = shalt.err (!%p941_p0)
}
  0x25   :  { %53 = dma.hbm_to_vmem [thread:$0]  %s1079_s3, 4096, %s48_s16, [#allocation6], %s994_s27, %s994_s27, %s995_s28  }
  0x26   :  { %s953_s0 = scalar_lea.vmem %s62_s1, 2048  ;;  %p958_p2 = scmp.lt.s32.totalorder %s62_s1, %s62_s1 }
  0x27   :  { %p954_p1 = scmp.ne.s32.totalorder %s62_s1, %s953_s0  ;;  %p959_p3 = scmp.lt.s32.totalorder %s953_s0, %s953_s0 }
  0x29   :  { %p960_p4 = por %p959_p3, %p958_p2 }
  0x2b   :  { %p961_p5 = pnand %p960_p4, %p954_p1 }
  0x2d   :  { %964 = shalt.err (!%p961_p5)
}
  0x2e   :  { %67 = dma.hbm_to_vmem [thread:$0]  %s1081_s5, 2048, %s62_s1, [#allocation9], %s997_s11, %s997_s11, %s998_s12  }
  0x2f   :  { %985 = dma.done.wait [#allocation3], 128  }
  0x30   :  { %986 = vsyncadd [#allocation3], 4294967168 }
  0x31   :  { %987 = dma.done.wait [#allocation6], 6144  }
  0x32   :  { %988 = vsyncadd [#allocation6], 4294961152 }
  0x33   :  { %989 = dma.done.wait [#allocation9], 2048  }
  0x34   :  { %990 = vsyncadd [#allocation9], 4294965248  ;;  %v1001_v0 = vmov 0   ;;  %v796_v1 = vld [vmem:[#allocation5 + $0x74] ss:$8 sps:$4 sm:$0xff]   ;;  %v873_v54 = vld [vmem:[#allocation8 + $0x68] sm:$0xff]   ;;  %v169_v60 = vlaneseq }
  0x35   :  { %297 = vmatprep.mubr.bf16.mxu0 %v1001_v0  ;;  %v798_v2 = vld [vmem:[#allocation5 + $0x70] ss:$8 sps:$4 sm:$0xff]   ;;  %265 = vmatprep.subr.bf16.mxu0 %v796_v1  ;;  %v799_v3 = vld [vmem:[#allocation5 + $0x64] ss:$8 sps:$4 sm:$0xff]   ;;  %v801_v4 = vld [vmem:[#allocation5 + $0x60] ss:$8 sps:$4 sm:$0xff]  }
  0x36   :  { %266 = vmatpush1.bf16.msra.mxu0 %v798_v2  ;;  %v802_v5 = vld [vmem:[#allocation5 + $0x54] ss:$8 sps:$4 sm:$0xff]   ;;  %v804_v6 = vld [vmem:[#allocation5 + $0x50] ss:$8 sps:$4 sm:$0xff]   ;;  %v805_v7 = vld [vmem:[#allocation5 + $0x44] ss:$8 sps:$4 sm:$0xff]  }
  0x37   :  { %267 = vmatprep.subr.bf16.mxu0 %v799_v3  ;;  %v807_v8 = vld [vmem:[#allocation5 + $0x40] ss:$8 sps:$4 sm:$0xff]   ;;  %v808_v9 = vld [vmem:[#allocation5 + $0x34] ss:$8 sps:$4 sm:$0xff]   ;;  %v823_v11 = vld [vmem:[#allocation7 + $0x70] ss:$8 sps:$4 sm:$0xff]  }
  0x38   :  { %v821_v10 = vld [vmem:[#allocation7 + $0x74] ss:$8 sps:$4 sm:$0xff]   ;;  %v824_v12 = vld [vmem:[#allocation7 + $0x64] ss:$8 sps:$4 sm:$0xff]   ;;  %v810_v13 = vld [vmem:[#allocation5 + $0x30] ss:$8 sps:$4 sm:$0xff]  }
  0x39   :  { %485 = vmatprep.subr.bf16.mxu1 %v821_v10  ;;  %v826_v14 = vld [vmem:[#allocation7 + $0x60] ss:$8 sps:$4 sm:$0xff]   ;;  %v811_v15 = vld [vmem:[#allocation5 + $0x24] ss:$8 sps:$4 sm:$0xff]   ;;  %v827_v16 = vld [vmem:[#allocation7 + $0x54] ss:$8 sps:$4 sm:$0xff]  }
  0x3a   :  { %268 = vmatpush1.bf16.msra.mxu0 %v801_v4  ;;  %486 = vmatpush1.bf16.msra.mxu1 %v823_v11  ;;  %v813_v17 = vld [vmem:[#allocation5 + $0x20] ss:$8 sps:$4 sm:$0xff]   ;;  %v829_v18 = vld [vmem:[#allocation7 + $0x50] ss:$8 sps:$4 sm:$0xff]   ;;  %v814_v19 = vld [vmem:[#allocation5 + $0x14] ss:$8 sps:$4 sm:$0xff]  }
  0x3b   :  { %269 = vmatprep.subr.bf16.mxu0 %v802_v5  ;;  %487 = vmatprep.subr.bf16.mxu1 %v824_v12  ;;  %v830_v20 = vld [vmem:[#allocation7 + $0x44] ss:$8 sps:$4 sm:$0xff]   ;;  %v816_v21 = vld [vmem:[#allocation5 + $0x10] ss:$8 sps:$4 sm:$0xff]   ;;  %v832_v22 = vld [vmem:[#allocation7 + $0x40] ss:$8 sps:$4 sm:$0xff]  }
  0x3c   :  { %v817_v23 = vld [vmem:[#allocation5 + $0x4] ss:$8 sps:$4 sm:$0xff]   ;;  %v833_v24 = vld [vmem:[#allocation7 + $0x34] ss:$8 sps:$4 sm:$0xff]   ;;  %v819_v25 = vld [vmem:[#allocation5] ss:$8 sps:$4 sm:$0xff]  }
  0x3d   :  { %v835_v26 = vld [vmem:[#allocation7 + $0x30] ss:$8 sps:$4 sm:$0xff]   ;;  %v836_v28 = vld [vmem:[#allocation7 + $0x24] ss:$8 sps:$4 sm:$0xff]   ;;  %v838_v29 = vld [vmem:[#allocation7 + $0x20] ss:$8 sps:$4 sm:$0xff]  }
  0x3e   :  { %270 = vmatpush1.bf16.msra.mxu0 %v804_v6  ;;  %488 = vmatpush1.bf16.msra.mxu1 %v826_v14  ;;  %v820_v27 = vld [vmem:[#allocation2] sm:$0xff]   ;;  %v842_v32 = vld [vmem:[#allocation7 + $0x4] ss:$8 sps:$4 sm:$0xff]   ;;  %v844_v33 = vld [vmem:[#allocation7] ss:$8 sps:$4 sm:$0xff]   ;;  %v170_v61 = vshrl.u32 %v169_v60, 7 }
  0x3f   :  { %271 = vmatprep.subr.bf16.mxu0 %v805_v7  ;;  %489 = vmatprep.subr.bf16.mxu1 %v827_v16  ;;  %v839_v30 = vld [vmem:[#allocation7 + $0x14] ss:$8 sps:$4 sm:$0xff]   ;;  %v841_v31 = vld [vmem:[#allocation7 + $0x10] ss:$8 sps:$4 sm:$0xff]   ;;  %v848_v36 = vld [vmem:[#allocation7 + $0xe4] ss:$8 sps:$4 sm:$0xff]  }
  0x40   :  { %v845_v34 = vld [vmem:[#allocation7 + $0xf4] ss:$8 sps:$4 sm:$0xff]   ;;  %v847_v35 = vld [vmem:[#allocation7 + $0xf0] ss:$8 sps:$4 sm:$0xff]   ;;  %v850_v37 = vld [vmem:[#allocation7 + $0xe0] ss:$8 sps:$4 sm:$0xff]  }
  0x41   :  { %v851_v38 = vld [vmem:[#allocation7 + $0xd4] ss:$8 sps:$4 sm:$0xff]   ;;  %v853_v39 = vld [vmem:[#allocation7 + $0xd0] ss:$8 sps:$4 sm:$0xff]   ;;  %v854_v40 = vld [vmem:[#allocation7 + $0xc4] ss:$8 sps:$4 sm:$0xff]  }
  0x42   :  { %272 = vmatpush1.bf16.msra.mxu0 %v807_v8  ;;  %490 = vmatpush1.bf16.msra.mxu1 %v829_v18  ;;  %v856_v41 = vld [vmem:[#allocation7 + $0xc0] ss:$8 sps:$4 sm:$0xff]   ;;  %v857_v42 = vld [vmem:[#allocation7 + $0xb4] ss:$8 sps:$4 sm:$0xff]   ;;  %v859_v43 = vld [vmem:[#allocation7 + $0xb0] ss:$8 sps:$4 sm:$0xff]  }
  0x43   :  { %273 = vmatprep.subr.bf16.mxu0 %v808_v9  ;;  %491 = vmatprep.subr.bf16.mxu1 %v830_v20  ;;  %v860_v44 = vld [vmem:[#allocation7 + $0xa4] ss:$8 sps:$4 sm:$0xff]   ;;  %v862_v45 = vld [vmem:[#allocation7 + $0xa0] ss:$8 sps:$4 sm:$0xff]   ;;  %v863_v46 = vld [vmem:[#allocation7 + $0x94] ss:$8 sps:$4 sm:$0xff]  }
  0x44   :  { %v865_v47 = vld [vmem:[#allocation7 + $0x90] ss:$8 sps:$4 sm:$0xff]   ;;  %v866_v48 = vld [vmem:[#allocation7 + $0x84] ss:$8 sps:$4 sm:$0xff]   ;;  %v868_v49 = vld [vmem:[#allocation7 + $0x80] ss:$8 sps:$4 sm:$0xff]  }
  0x45   :  { %v869_v50 = vld [vmem:[#allocation8 + $0x78] sm:$0xff]   ;;  %v871_v52 = vld [vmem:[#allocation8 + $0x70] sm:$0xff]   ;;  %v874_v55 = vld [vmem:[#allocation8 + $0x28] sm:$0xff]   ;;  %v175_v62 = vsub.s32 1, %v170_v61  ;;  %v171_v63 = vsub.s32 0, %v170_v61  ;;  %s1002_s25 = smov [#allocation10]  }
  0x46   :  { %274 = vmatpush1.bf16.msra.mxu0 %v810_v13  ;;  %492 = vmatpush1.bf16.msra.mxu1 %v832_v22  ;;  %v870_v51 = vld [vmem:[#allocation8 + $0x38] sm:$0xff]   ;;  %v872_v53 = vld [vmem:[#allocation8 + $0x30] sm:$0xff]   ;;  %v875_v56 = vld [vmem:[#allocation8 + $0x60] sm:$0xff]   ;;  %s684_s26 = sshll.u32 %s1002_s25, 4  ;;  %s685_s26 = int_to_ptr.vmem [resolvable:$true] %s684_s26 }
  0x47   :  { %275 = vmatprep.subr.bf16.mxu0 %v811_v15  ;;  %493 = vmatprep.subr.bf16.mxu1 %v833_v24  ;;  %v876_v57 = vld [vmem:[#allocation8 + $0x20] sm:$0xff]   ;;  %v877_v58 = vld [vmem:[#allocation8 + $0x58] sm:$0xff]   ;;  %v880_v18 = vld [vmem:[#allocation8 + $0x10] sm:$0xff]   ;;  %s965_s29 = scalar_lea.vmem %s685_s26, 256  ;;  %p970_p7 = scmp.lt.s32.totalorder %s685_s26, %s685_s26 }
  0x48   :  { %v878_v59 = vld [vmem:[#allocation8 + $0x18] sm:$0xff]   ;;  %v882_v20 = vld [vmem:[#allocation8 + $0x8] sm:$0xff]   ;;  %v884_v22 = vld [vmem:[#allocation8] sm:$0xff]   ;;  %p966_p6 = scmp.ne.s32.totalorder %s685_s26, %s965_s29  ;;  %p971_p8 = scmp.lt.s32.totalorder %s965_s29, %s965_s29 }
  0x49   :  { %v163_v0 = vld [vmem:[%s1078_s2] sm:$0x3] }
  0x4a   :  { %276 = vmatpush1.bf16.msra.mxu0 %v813_v17  ;;  %494 = vmatpush1.bf16.msra.mxu1 %v835_v26  ;;  %v176_v2 = vrot.slane %v163_v0, %v175_v62  ;;  %v172_v3 = vrot.slane %v163_v0, %v171_v63  ;;  %v879_v17 = vld [vmem:[#allocation8 + $0x50] sm:$0xff]   ;;  %p972_p9 = por %p971_p8, %p970_p7 }
  0x4b   :  { %277 = vmatprep.subr.bf16.mxu0 %v814_v19  ;;  %495 = vmatprep.subr.bf16.mxu1 %v836_v28  ;;  %v881_v19 = vld [vmem:[#allocation8 + $0x48] sm:$0xff]  }
  0x4c   :  { %p973_p10 = pnand %p972_p9, %p966_p6 }
  0x4e   :  { %278 = vmatpush1.bf16.msra.mxu0 %v816_v21  ;;  %496 = vmatpush1.bf16.msra.mxu1 %v838_v29  ;;  %v883_v21 = vld [vmem:[#allocation8 + $0x40] sm:$0xff]  }
  0x4f   :  { %279 = vmatprep.subr.bf16.mxu0 %v817_v23  ;;  %497 = vmatprep.subr.bf16.mxu1 %v839_v30  ;;  %v164_v23 = vld [vmem:[%s1080_s4] sm:$0x3] }
  0x50   :  { %v318_v26 = vrot.slane %v164_v23, %v171_v63 }
  0x52   :  { %280 = vmatpush1.bf16.msra.mxu0 %v819_v25  ;;  %498 = vmatpush1.bf16.msra.mxu1 %v841_v31  ;;  %v322_v25 = vrot.slane %v164_v23, %v175_v62 }
  0x53   :  { %499 = vmatprep.subr.bf16.mxu1 %v842_v32  ;;  %764 = vmatprep.subr.bf16.mxu0 %v869_v50 }
  0x55   :  { %298 = vmatmul.mubr.bf16.vlgmr.msra.gmra.mxu0 %v820_v27 }
  0x56   :  { %500 = vmatpush1.bf16.msra.mxu1 %v844_v33  ;;  %765 = vmatpush3.bf16.msra.mxu0 %v870_v51 }
  0x57   :  { %501 = vmatprep.subr.bf16.mxu1 %v845_v34  ;;  %766 = vmatprep.subr.bf16.mxu0 %v871_v52 }
  0x5a   :  { %502 = vmatpush2.bf16.msra.mxu1 %v847_v35  ;;  %767 = vmatpush3.bf16.msra.mxu0 %v872_v53 }
  0x5b   :  { %503 = vmatprep.subr.bf16.mxu1 %v848_v36  ;;  %768 = vmatprep.subr.bf16.mxu0 %v873_v54 }
  0x5e   :  { %504 = vmatpush2.bf16.msra.mxu1 %v850_v37  ;;  %769 = vmatpush3.bf16.msra.mxu0 %v874_v55 }
  0x5f   :  { %505 = vmatprep.subr.bf16.mxu1 %v851_v38  ;;  %770 = vmatprep.subr.bf16.mxu0 %v875_v56 }
  0x62   :  { %506 = vmatpush2.bf16.msra.mxu1 %v853_v39  ;;  %771 = vmatpush3.bf16.msra.mxu0 %v876_v57 }
  0x63   :  { %507 = vmatprep.subr.bf16.mxu1 %v854_v40  ;;  %772 = vmatprep.subr.bf16.mxu0 %v877_v58 }
  0x66   :  { %508 = vmatpush2.bf16.msra.mxu1 %v856_v41  ;;  %773 = vmatpush3.bf16.msra.mxu0 %v878_v59  ;;  %v747_v41 = vld [vmem:[%s1082_s6] ss:$0 sm:$0xff] }
  0x67   :  { %509 = vmatprep.subr.bf16.mxu1 %v857_v42  ;;  %774 = vmatprep.subr.bf16.mxu0 %v879_v17 }
  0x6a   :  { %510 = vmatpush2.bf16.msra.mxu1 %v859_v43  ;;  %775 = vmatpush3.bf16.msra.mxu0 %v880_v18 }
  0x6b   :  { %511 = vmatprep.subr.bf16.mxu1 %v860_v44  ;;  %776 = vmatprep.subr.bf16.mxu0 %v881_v19 }
  0x6e   :  { %512 = vmatpush2.bf16.msra.mxu1 %v862_v45  ;;  %777 = vmatpush3.bf16.msra.mxu0 %v882_v20 }
  0x6f   :  { %513 = vmatprep.subr.bf16.mxu1 %v863_v46  ;;  %778 = vmatprep.subr.bf16.mxu0 %v883_v21 }
  0x72   :  { %514 = vmatpush2.bf16.msra.mxu1 %v865_v47  ;;  %779 = vmatpush3.bf16.msra.mxu0 %v884_v22 }
  0x73   :  { %515 = vmatprep.subr.bf16.mxu1 %v866_v48 }
  0x76   :  { %516 = vmatpush2.bf16.msra.mxu1 %v868_v49 }
 0x115   :  { %v299_v1 = vpop.f32.mrf.mxu0 }
 0x116   :  { %v300_v8 = vadd.f32 %v299_v1, %v172_v3 }
 0x117   :  { %v301_v4 = vpop.f32.mrf.mxu0 }
 0x118   :  { %v302_v6 = vadd.f32 %v301_v4, %v176_v2  ;;  %v308_v14 = vmax.f32 %v300_v8, 0.0 }
 0x119   :  { %v303_v5 = vpop.f32.mrf.mxu0 }
 0x11a   :  { %v304_v7 = vadd.f32 %v303_v5, %v172_v3  ;;  %v309_v12 = vmax.f32 %v302_v6, 0.0 }
 0x11b   :  { %v305_v9 = vpop.f32.mrf.mxu0 }
 0x11c   :  { %v306_v10 = vadd.f32 %v305_v9, %v176_v2  ;;  %v310_v11 = vmax.f32 %v304_v7, 0.0 }
 0x11e   :  { %v311_v13 = vmax.f32 %v306_v10, 0.0  ;;  %v312_v16 = vpack.c.bf16 %v310_v11, %v308_v14 }
 0x120   :  { %v313_v15 = vpack.c.bf16 %v311_v13, %v309_v12 }
 0x122   :  { %517 = vmatprep.mubr.bf16.mxu1 %v313_v15 }
 0x123   :  { %518 = vmatmul.mubr.bf16.vlgmr.msra.gmra.mxu1 %v312_v16 }
 0x1e3   :  { %v519_v24 = vpop.f32.mrf.mxu1 }
 0x1e4   :  { %v520_v31 = vadd.f32 %v519_v24, %v318_v26 }
 0x1e5   :  { %v521_v27 = vpop.f32.mrf.mxu1 }
 0x1e6   :  { %v522_v29 = vadd.f32 %v521_v27, %v322_v25  ;;  %v528_v37 = vmax.f32 %v520_v31, 0.0 }
 0x1e7   :  { %v523_v28 = vpop.f32.mrf.mxu1 }
 0x1e8   :  { %v524_v30 = vadd.f32 %v523_v28, %v318_v26  ;;  %v529_v35 = vmax.f32 %v522_v29, 0.0 }
 0x1e9   :  { %v525_v32 = vpop.f32.mrf.mxu1 }
 0x1ea   :  { %v526_v33 = vadd.f32 %v525_v32, %v322_v25  ;;  %v530_v34 = vmax.f32 %v524_v30, 0.0 }
 0x1ec   :  { %v531_v36 = vmax.f32 %v526_v33, 0.0  ;;  %v532_v39 = vpack.c.bf16 %v530_v34, %v528_v37 }
 0x1ee   :  { %v533_v38 = vpack.c.bf16 %v531_v36, %v529_v35 }
 0x1f0   :  { %668 = vmatprep.mubr.bf16.mxu0 %v533_v38 }
 0x1f1   :  { %669 = vmatmul.mubr.bf16.vlgmr.msra.gmra.mxu0 %v532_v39 }
 0x2b1   :  { %v780_v40 = vpop.f32.mrf.mxu0 }
 0x2b3   :  { %v781_v42 = vpop.f32.mrf.mxu0 }
 0x2b4   :  { %v782_v43 = vadd.f32 %v781_v42, %v780_v40 }
 0x2b5   :  { %v783_v44 = vpop.f32.mrf.mxu0 }
 0x2b6   :  { %v671_v45 = vadd.f32 %v782_v43, %v747_v41 }
 0x2b7   :  { %v784_v46 = vpop.f32.mrf.mxu0 }
 0x2b8   :  { %677 = vst [vmem:[#allocation10] sm:$0xff] %v671_v45  ;;  %v785_v47 = vadd.f32 %v784_v46, %v783_v44 }
 0x2ba   :  { %v674_v48 = vadd.f32 %v785_v47, %v747_v41 }
 0x2bc   :  { %678 = vst [vmem:[#allocation10 + $0x8] sm:$0xff] %v674_v48 }
 0x2bd   :  { %976 = shalt.err (!%p973_p10)
}
 0x2be   :  { %690 = dma.vmem_to_hbm [thread:$0]  %s685_s26, 256, %s1083_s7, [#allocation4], %s994_s27, %s994_s27, %s995_s28  }
 0x2bf   :  { %991 = dma.done.wait [#allocation4], 256  }
 0x2c0   :  { %992 = vsyncadd [#allocation4], 4294967040 }
 0x2c1   :  { %694 = vsyncpa [#allocation3], 1 }
 0x2c2   :  { %695 = vsyncpa [#allocation6], 1 }
 0x2c3   :  { %696 = vsyncpa [#allocation9], 1 }
 0x2c4   :  { %697 = vsyncpa [#allocation4], 1 }

</bundles_post_ra>
